<compile_context>
chip_gen: v7x
topology: tpu7x:2x2x1
jax: 0.10.0
libtpu: 0.0.40
codegen_flags: <defaults>
</compile_context>

<pallas_src>
import functools

import jax
import jax.numpy as jnp
from jax.experimental import pallas as pl
from jax.experimental.pallas import tpu as pltpu

_LANES = 128
_SUBLANES = 8


def _round_up(x, m):
    return ((x + m - 1) // m) * m


# ----------------------------- kernels --------------------------------------


def _noclip_kernel(adv_ref, out_ref):
    # returns - values = (adv + values) - values == adv, so the forward value
    # of the unclipped loss only needs advantages.
    a = adv_ref[...].astype(jnp.float32)
    sq = a * a
    # Reduce (block_rows, 128) -> (8, 128): pure vreg adds, finalize happens
    # outside the kernel. Output block is lane-dense (unmasked vst).
    out_ref[...] = jnp.sum(sq.reshape(-1, _SUBLANES, _LANES), axis=0)


def _clip_kernel(values_ref, adv_ref, old_ref, out_ref, *, value_clip):
    v = values_ref[...].astype(jnp.float32)
    a = adv_ref[...].astype(jnp.float32)
    ov = old_ref[...].astype(jnp.float32)
    returns = a + v  # stop_gradient is a no-op for the forward value
    pred = ov + jnp.clip(v - ov, -value_clip, value_clip)
    d = returns - pred
    sq = d * d
    out_ref[...] = jnp.sum(sq.reshape(-1, _SUBLANES, _LANES), axis=0)


# ----------------------------- wrapper ---------------------------------------


def _vmem_budget_bytes():
    try:
        vmem = pltpu.get_tpu_info().vmem_capacity_bytes
    except Exception:
        vmem = 64 * 1024 * 1024  # v7x per-TC floor
    # Use at most half of physical VMEM, never more than 48 MiB of scoped VMEM.
    return int(min(vmem // 2, 48 * 1024 * 1024))


def _pick_block_rows(total_rows, n_inputs, budget_bytes):
    # 2 pipeline buffers per input + slack for f32 intermediates.
    per_block = budget_bytes // (2 * n_inputs + 4)
    block_rows = per_block // (_LANES * 4)
    block_rows = max(_SUBLANES, (block_rows // _SUBLANES) * _SUBLANES)
    block_rows = min(block_rows, 4096)  # 2 MiB f32 block: ~HBM roofline already
    block_rows = min(block_rows, _round_up(total_rows, _SUBLANES))
    return block_rows


def _prep(x, padded_rows):
    flat = jnp.ravel(x)
    padded_n = padded_rows * _LANES
    if padded_n != flat.shape[0]:
        # Zero padding contributes exactly 0 to the squared-error sum in both
        # the clipped and unclipped paths; we divide by the true element count.
        flat = jnp.pad(flat, (0, padded_n - flat.shape[0]))
    return flat.reshape(padded_rows, _LANES)


def value_loss(values, advantages, old_values=None,
               value_loss_coef=1.0, value_clip=None):
    """Forward pass of ValueLoss as a Pallas TPU kernel. Returns a scalar f32."""
    if values.shape != advantages.shape:
        raise ValueError("values and advantages must have the same shape")
    use_clip = value_clip is not None
    if use_clip:
        if old_values is None:
            raise ValueError("value_clip was given but old_values is None")
        if old_values.shape != values.shape:
            raise ValueError("old_values must match values' shape")
        value_clip = float(value_clip)  # must be a static Python float

    n = int(values.size)
    rows = pl.cdiv(n, _LANES)
    n_inputs = 3 if use_clip else 1

    budget = _vmem_budget_bytes()
    block_rows = _pick_block_rows(rows, n_inputs, budget)
    padded_rows = _round_up(max(rows, block_rows), block_rows)
    num_blocks = padded_rows // block_rows
    grid = (num_blocks,)

    in_spec = pl.BlockSpec((block_rows, _LANES), lambda i: (i, 0))
    out_spec = pl.BlockSpec((_SUBLANES, _LANES), lambda i: (i, 0))
    out_shape = jax.ShapeDtypeStruct((num_blocks * _SUBLANES, _LANES),
                                     jnp.float32)

    if use_clip:
        kern = functools.partial(_clip_kernel, value_clip=value_clip)
        args = (_prep(values, padded_rows),
                _prep(advantages, padded_rows),
                _prep(old_values, padded_rows))
    else:
        kern = _noclip_kernel
        args = (_prep(advantages, padded_rows),)

    partials = pl.pallas_call(
        kern,
        out_shape=out_shape,
        grid_spec=pltpu.PrefetchScalarGridSpec(
            num_scalar_prefetch=0,
            grid=grid,
            in_specs=[in_spec] * n_inputs,
            out_specs=out_spec,
        ),
        compiler_params=pltpu.CompilerParams(
            dimension_semantics=("parallel",),
            vmem_limit_bytes=budget,
        ),
    )(*args)

    # Tiny finalize in plain JAX: one sum over (num_blocks*8, 128) partials,
    # then the hoisted 0.5 / coef / mean scales.
    total = jnp.sum(partials)
    return (jnp.float32(value_loss_coef) * jnp.float32(0.5) * total
            ) / jnp.float32(n)


# ----------------------------- reference & test ------------------------------


def _value_loss_ref(values, advantages, old_values=None,
                    value_loss_coef=1.0, value_clip=None):
    returns = jax.lax.stop_gradient(advantages + values)
    if value_clip is None or old_values is None:
        loss = jnp.mean(jnp.square(returns - values) * 0.5)
    else:
        old_values = jax.lax.stop_gradient(old_values)
        vpredclipped = old_values + jnp.clip(values - old_values,
                                             -value_clip, value_clip)
        loss = jnp.mean(jnp.square(returns - vpredclipped) * 0.5)
    return value_loss_coef * loss


if __name__ == "__main__":
    key = jax.random.PRNGKey(0)
    k1, k2, k3 = jax.random.split(key, 3)

    B, T = 16, 128  # batch of 16, 128 value predictions per row
    values = jax.random.normal(k1, (B, T), dtype=jnp.float32)
    advantages = jax.random.normal(k2, (B, T), dtype=jnp.float32)
    old_values = values + 0.3 * jax.random.normal(k3, (B, T), dtype=jnp.float32)

    # Case 1: no clipping (only `advantages` is streamed through the kernel).
    loss_noclip = jax.block_until_ready(
        value_loss(values, advantages, None,
                   value_loss_coef=1.0, value_clip=None))
    ref_noclip = _value_loss_ref(values, advantages, None, 1.0, None)

    # Case 2: clipped value loss (3-input kernel).
    loss_clip = jax.block_until_ready(
        value_loss(values, advantages, old_values,
                   value_loss_coef=0.5, value_clip=0.2))
    ref_clip = _value_loss_ref(values, advantages, old_values, 0.5, 0.2)

    assert jnp.allclose(loss_noclip, ref_noclip, rtol=1e-5, atol=1e-6), (
        loss_noclip, ref_noclip)
    assert jnp.allclose(loss_clip, ref_clip, rtol=1e-5, atol=1e-6), (
        loss_clip, ref_clip)

    print("KERNEL_OK")
</pallas_src>

<mosaic_0001>
module attributes {stable_mosaic.version = 11 : i64} {
  func.func @_noclip_kernel(%arg0: i32, %arg1: memref<16x128xf32, #tpu.memory_space<vmem>>, %arg2: memref<8x128xf32, #tpu.memory_space<vmem>>) attributes {dimension_semantics = [#tpu.dimension_semantics<parallel>], iteration_bounds = array<i64: 1>, scalar_prefetch = 0 : i64, scratch_operands = 0 : i64, tpu.core_type = #tpu.core_type<tc>, window_params = [{transform_indices = @transform_0, window_bounds = array<i64: 16, 128>}, {transform_indices = @transform_1, window_bounds = array<i64: 8, 128>}]} {
    %c0 = arith.constant 0 : index
    %c0_0 = arith.constant 0 : index
    %0 = vector.load %arg1[%c0, %c0_0] : memref<16x128xf32, #tpu.memory_space<vmem>>, vector<16x128xf32>
    %1 = arith.mulf %0, %0 : vector<16x128xf32>
    %2 = vector.shape_cast %1 : vector<16x128xf32> to vector<2x8x128xf32>
    %cst = arith.constant dense<0.000000e+00> : vector<8x128xf32>
    %3 = vector.multi_reduction <add>, %2, %cst [0] : vector<2x8x128xf32> to vector<8x128xf32>
    %c0_1 = arith.constant 0 : index
    %c0_2 = arith.constant 0 : index
    %4 = vector.load %arg2[%c0_1, %c0_2] : memref<8x128xf32, #tpu.memory_space<vmem>>, vector<8x128xf32>
    tpu.vector_store %arg2[%c0_1, %c0_2], %3 {strides = array<i32>} : memref<8x128xf32, #tpu.memory_space<vmem>>, vector<8x128xf32>,
    return
  }
  func.func @transform_0(%arg0: i32) -> (i32, i32) {
    %c0_i32 = arith.constant 0 : i32
    %c0_i32_0 = arith.constant 0 : i32
    return %arg0, %c0_i32 : i32, i32
  }
  func.func @transform_1(%arg0: i32) -> (i32, i32) {
    %c0_i32 = arith.constant 0 : i32
    %c0_i32_0 = arith.constant 0 : i32
    return %arg0, %c0_i32 : i32, i32
  }
}

</mosaic_0001>

<bundles_post_ra>
// kernel: tpu_custom_call.1
= control target key start
LH: loop header
LB: loop body
LE: loop exit
PB: predicated region body
PF: predicated region fallthrough
CT: control target
= control target key end

     0   :  { %6 = vsyncpa [#allocation3], 0  ;;  %s134_s0 = inlined_call_operand.hbm [shape: f32[16,128], index: 0, kind: input, shape index: {}]   ;;  %s135_s1 = inlined_call_operand.hbm [shape: f32[8,128], index: 1, kind: output, shape index: {}]  }
   0x1   :  { %7 = vsyncpa [#allocation4], 0  ;;  %s96_s6 = smov [#allocation2]   ;;  %s48_s10 = scalar_lea.hbm %s134_s0, 256 }
   0x2   :  { %s13_s7 = sshll.u32 %s96_s6, 4  ;;  %p49_p0 = scmp.ne.s32.totalorder %s134_s0, %s48_s10  ;;  %s14_s7 = int_to_ptr.vmem [resolvable:$true] %s13_s7 }
   0x3   :  { %p52_p1 = scmp.lt.u32.totalorder %s48_s10, %s134_s0 }
   0x5   :  { %p54_p2 = pnand %p52_p1, %p49_p0 }
   0x7   :  { %57 = shalt.err (!%p54_p2)
}
   0x8   :  { %s58_s15 = scalar_lea.vmem %s14_s7, 256  ;;  %p63_p4 = scmp.lt.s32.totalorder %s14_s7, %s14_s7 }
   0x9   :  { %p59_p3 = scmp.ne.s32.totalorder %s14_s7, %s58_s15  ;;  %p64_p5 = scmp.lt.s32.totalorder %s58_s15, %s58_s15 }
   0xb   :  { %p65_p6 = por %p64_p5, %p63_p4 }
   0xd   :  { %p66_p7 = pnand %p65_p6, %p59_p3 }
   0xf   :  { %69 = shalt.err (!%p66_p7)
}
  0x10   :  { %s97_s16 = smov 128   ;;  %s98_s17 = smov 8  }
  0x11   :  { %19 = dma.hbm_to_vmem [thread:$0]  %s134_s0, 256, %s14_s7, [#allocation3], %s97_s16, %s97_s16, %s98_s17  }
  0x12   :  { %92 = dma.done.wait [#allocation3], 256  }
  0x13   :  { %93 = vsyncadd [#allocation3], 4294967040  ;;  %v23_v0 = vld [vmem:[#allocation2] sm:$0xff]  ;;  %v24_v1 = vld [vmem:[#allocation2 + $0x8] sm:$0xff]  ;;  %s99_s20 = smov [#allocation5]  }
  0x14   :  { %s35_s21 = sshll.u32 %s99_s20, 4  ;;  %v25_v2 = vmul.f32 %v23_v0, %v23_v0  ;;  %v26_v3 = vmul.f32 %v24_v1, %v24_v1  ;;  %s36_s21 = int_to_ptr.vmem [resolvable:$true] %s35_s21 }
  0x15   :  { %s70_s22 = scalar_lea.vmem %s36_s21, 128  ;;  %p75_p9 = scmp.lt.s32.totalorder %s36_s21, %s36_s21 }
  0x16   :  { %v27_v4 = vadd.f32 %v26_v3, %v25_v2  ;;  %p71_p8 = scmp.ne.s32.totalorder %s36_s21, %s70_s22  ;;  %p76_p10 = scmp.lt.s32.totalorder %s70_s22, %s70_s22 }
  0x18   :  { %28 = vst [vmem:[#allocation5] sm:$0xff] %v27_v4  ;;  %p77_p11 = por %p76_p10, %p75_p9 }
  0x1a   :  { %p78_p12 = pnand %p77_p11, %p71_p8 }
  0x1c   :  { %81 = shalt.err (!%p78_p12)
}
  0x1d   :  { %s82_s24 = scalar_lea.hbm %s135_s1, 128 }
  0x1e   :  { %p83_p13 = scmp.ne.s32.totalorder %s135_s1, %s82_s24  ;;  %p86_p0 = scmp.lt.u32.totalorder %s82_s24, %s135_s1 }
  0x20   :  { %p88_p1 = pnand %p86_p0, %p83_p13 }
  0x22   :  { %91 = shalt.err (!%p88_p1)
}
  0x23   :  { %38 = dma.vmem_to_hbm [thread:$0]  %s36_s21, 128, %s135_s1, [#allocation4]  }
  0x24   :  { %94 = dma.done.wait [#allocation4], 128  }
  0x25   :  { %95 = vsyncadd [#allocation4], 4294967168 }
  0x26   :  { %42 = vsyncpa [#allocation3], 1 }
  0x27   :  { %43 = vsyncpa [#allocation4], 1 }

</bundles_post_ra>
